<compile_context>
chip_gen: v6e
topology: v6e:2x2x1
jax: 0.10.0
libtpu: 0.0.40
codegen_flags: <defaults>
</compile_context>

<pallas_src>
import functools

import jax
import jax.numpy as jnp
from jax.experimental import pallas as pl
from jax.experimental.pallas import tpu as pltpu


def _round_up(x, m):
    return ((x + m - 1) // m) * m


def _maxent_kernel(x_ref, j_ref, h_ref, eff_ref, out_ref, *, states, lp):
    """One (TN, S*LP) row tile of sequences -> (TN, 1) weighted per-sequence pll."""
    x = x_ref[...]          # (TN, S*LP) bf16 one-hot, state-major layout (exact)
    J = j_ref[...]          # (S*LP, S*LP) bf16 symmetrized, zero-diag couplings
    h = h_ref[...]          # (1, S*LP)  f32 fields
    eff = eff_ref[...]      # (TN, 1)    f32 per-sequence weights (0 on padded rows)

    # Logits H = -(h + x @ Jsym)   (MXU bf16 x bf16, f32 accumulate).
    Hn = -(h + jnp.dot(x, J, preferred_element_type=jnp.float32))   # (TN, S*LP) f32

    # Exact per-position max over the `states` slabs (128-aligned static lane slices
    # -> pure vreg selection, no cross-lane movement).
    m = Hn[:, 0:lp]
    for s in range(1, states):
        m = jnp.maximum(m, Hn[:, s * lp:(s + 1) * lp])               # (TN, LP)

    # Per-position partition sums + folded cross-entropy:
    #   sum_d -x*log_softmax = sum_l xg_l*(m_l + log gs_l) - sum_d x*H
    #                        = sum_l xg_l*log gs_l - sum_d x*(H - m)      (xg = x @ 1)
    group_sum = jnp.zeros_like(m)
    xg = jnp.zeros_like(m)
    ce = jnp.zeros_like(m)
    for s in range(states):
        Hs = Hn[:, s * lp:(s + 1) * lp] - m                           # <= 0
        group_sum = group_sum + jnp.exp(Hs)
        xs = x[:, s * lp:(s + 1) * lp].astype(jnp.float32)
        xg = xg + xs
        ce = ce - xs * Hs
    # group_sum >= 1 always (exp(0) at the per-group argmax), so log is safe even on
    # padded lanes / rows; padded lanes have xg == 0 and contribute exactly 0.
    ce = ce + xg * jnp.log(group_sum)

    per_seq = jnp.sum(ce, axis=-1, keepdims=True)                     # (TN, 1)
    out_ref[...] = per_seq * eff


def maxent_forward(msa_filted_onehot, msa_eff, h, J, num_aa_filted, states,
                   *, row_tile=256):
    """Pallas implementation of MaxEntModel.forward (returns the scalar loss)."""
    L, S = num_aa_filted, states
    D = L * S

    # ---- parameter glue + L2 regularizers in plain JAX (f32, exact semantics) ----
    Jf = J.astype(jnp.float32)
    Jsym = (Jf + Jf.T) * 0.5 * (1.0 - jnp.eye(D, dtype=jnp.float32))
    hf = h.astype(jnp.float32)
    l2_h = 0.01 * jnp.sum(hf * hf)
    l2_j = 0.01 * jnp.sum(Jsym * Jsym) * 0.5 * (L - 1) * (S - 1)

    # ---- state-major, lane-padded layout:  column index = s*LP + l ----
    LP = _round_up(L, 128)                    # lane-dense position axis per state slab
    DR = S * LP                               # reordered / padded coupling width
    x3 = msa_filted_onehot.reshape(-1, L, S)
    N = x3.shape[0]
    TN = min(row_tile, _round_up(N, 8))       # row tile (multiple of 8 sublanes)
    NP = _round_up(N, TN)

    x_sm = jnp.transpose(x3.astype(jnp.bfloat16), (0, 2, 1))          # (N, S, L)
    x_p = (jnp.zeros((NP, S, LP), jnp.bfloat16)
           .at[:N, :, :L].set(x_sm).reshape(NP, DR))
    eff_p = jnp.zeros((NP, 1), jnp.float32).at[:N, 0].set(
        msa_eff.reshape(-1).astype(jnp.float32))

    # Jr[(s,l),(s',l')] = Jsym[l*S+s, l'*S+s']
    J4 = Jsym.reshape(L, S, L, S).transpose(1, 0, 3, 2)                # (S, L, S, L)
    j_p = (jnp.zeros((S, LP, S, LP), jnp.float32)
           .at[:, :L, :, :L].set(J4).astype(jnp.bfloat16).reshape(DR, DR))
    h_p = (jnp.zeros((S, LP), jnp.float32)
           .at[:, :L].set(hf.reshape(L, S).T).reshape(1, DR))

    # ---- VMEM budget: resident Jsym/h + double-buffered x tiles + f32 temps.
    # Clamped to 48 MiB so the request is safe on v5e/v6e (128 MiB) and v7x (64 MiB).
    # TODO(synk): for very large D (L*S in the thousands) Jsym no longer fits VMEM and
    # the matmul would need a K-tiled grid axis with an A accumulator in scratch.
    est = (DR * DR * 2 + DR * 4                # resident Jsym (bf16) + h (f32)
           + 2 * TN * DR * 2 + 4 * TN * 4      # double-buffered x / eff / out
           + TN * DR * 4 + 6 * TN * LP * 4)    # f32 logits + slab temporaries
    vmem_limit = int(min(max(2 * est, 32 * 1024 * 1024), 48 * 1024 * 1024))

    grid = (NP // TN,)
    kernel = functools.partial(_maxent_kernel, states=S, lp=LP)
    per_seq_w = pl.pallas_call(
        kernel,
        out_shape=jax.ShapeDtypeStruct((NP, 1), jnp.float32),
        grid_spec=pltpu.PrefetchScalarGridSpec(
            num_scalar_prefetch=0,
            grid=grid,
            in_specs=[
                pl.BlockSpec((TN, DR), lambda i: (i, 0)),   # x: streamed row tiles
                pl.BlockSpec((DR, DR), lambda i: (0, 0)),   # Jsym: resident
                pl.BlockSpec((1, DR), lambda i: (0, 0)),    # h: resident
                pl.BlockSpec((TN, 1), lambda i: (i, 0)),    # eff: streamed
            ],
            out_specs=pl.BlockSpec((TN, 1), lambda i: (i, 0)),
        ),
        compiler_params=pltpu.CompilerParams(
            dimension_semantics=("parallel",),
            vmem_limit_bytes=vmem_limit,
        ),
    )(x_p, j_p, h_p, eff_p)

    pll = jnp.sum(per_seq_w)
    return pll + l2_h + l2_j


def _maxent_reference(msa_onehot, msa_eff, h, J, L, S):
    """Pure-JAX transcription of the PyTorch forward, for a sanity check."""
    D = L * S
    Jsym = (J + J.T) * 0.5 * (1.0 - jnp.eye(D, dtype=J.dtype))
    x = msa_onehot.reshape(-1, D)
    H = -(h + x @ Jsym).reshape(-1, L, S)
    ls = jax.nn.log_softmax(H, axis=-1)
    pll = jnp.sum(jnp.sum(-x.reshape(-1, L, S) * ls, axis=(-2, -1)) * msa_eff)
    l2_h = 0.01 * jnp.sum(h ** 2)
    l2_j = 0.01 * jnp.sum(Jsym ** 2) * 0.5 * (L - 1) * (S - 1)
    return pll + l2_h + l2_j


if __name__ == "__main__":
    # Small, deterministic problem: 16 sequences, 8 filtered positions, 4 states.
    N, L, S = 16, 8, 4
    D = L * S

    key = jax.random.PRNGKey(0)
    k_cat, k_eff, k_h, k_J = jax.random.split(key, 4)

    cats = jax.random.randint(k_cat, (N, L), 0, S)
    msa_onehot = jax.nn.one_hot(cats, S, dtype=jnp.float32)          # (N, L, S)
    msa_eff = jax.random.uniform(k_eff, (N,), dtype=jnp.float32)     # (N,)

    # Module __init__ zero-initializes h and J; use small deterministic random
    # values so the forward pass is non-trivial.
    h = 0.01 * jax.random.normal(k_h, (D,), dtype=jnp.float32)
    J = 0.01 * jax.random.normal(k_J, (D, D), dtype=jnp.float32)

    loss = maxent_forward(msa_onehot, msa_eff, h, J, L, S)
    loss = jax.block_until_ready(loss)

    ref = jax.block_until_ready(_maxent_reference(msa_onehot, msa_eff, h, J, L, S))
    if not bool(jnp.abs(loss - ref) <= 1e-2 + 5e-2 * jnp.abs(ref)):
        raise AssertionError(f"mismatch: kernel={float(loss)} ref={float(ref)}")

    print("KERNEL_OK")
</pallas_src>

<mosaic_0001>
module attributes {stable_mosaic.version = 11 : i64} {
  func.func @_maxent_kernel(%arg0: i32, %arg1: memref<16x512xbf16, #tpu.memory_space<vmem>>, %arg2: memref<512x512xbf16, #tpu.memory_space<vmem>>, %arg3: memref<1x512xf32, #tpu.memory_space<vmem>>, %arg4: memref<16x1xf32, #tpu.memory_space<vmem>>, %arg5: memref<16x1xf32, #tpu.memory_space<vmem>>) attributes {dimension_semantics = [#tpu.dimension_semantics<parallel>], iteration_bounds = array<i64: 1>, scalar_prefetch = 0 : i64, scratch_operands = 0 : i64, tpu.core_type = #tpu.core_type<tc>, window_params = [{transform_indices = @transform_0, window_bounds = array<i64: 16, 512>}, {pipeline_mode = #tpu.pipeline_mode<synchronous>, transform_indices = @transform_1, window_bounds = array<i64: 512, 512>}, {pipeline_mode = #tpu.pipeline_mode<synchronous>, transform_indices = @transform_2, window_bounds = array<i64: 1, 512>}, {transform_indices = @transform_3, window_bounds = array<i64: 16, 1>}, {transform_indices = @transform_4, window_bounds = array<i64: 16, 1>}]} {
    %c0 = arith.constant 0 : index
    %c0_0 = arith.constant 0 : index
    %0 = vector.load %arg1[%c0, %c0_0] : memref<16x512xbf16, #tpu.memory_space<vmem>>, vector<16x512xbf16>
    %c0_1 = arith.constant 0 : index
    %c0_2 = arith.constant 0 : index
    %1 = vector.load %arg2[%c0_1, %c0_2] : memref<512x512xbf16, #tpu.memory_space<vmem>>, vector<512x512xbf16>
    %c0_3 = arith.constant 0 : index
    %c0_4 = arith.constant 0 : index
    %2 = vector.load %arg3[%c0_3, %c0_4] : memref<1x512xf32, #tpu.memory_space<vmem>>, vector<1x512xf32>
    %c0_5 = arith.constant 0 : index
    %c0_6 = arith.constant 0 : index
    %3 = vector.load %arg4[%c0_5, %c0_6] : memref<16x1xf32, #tpu.memory_space<vmem>>, vector<16x1xf32>
    %cst = arith.constant dense<0.000000e+00> : vector<16x512xf32>
    %4 = tpu.matmul %0, %1, %cst {dimension_numbers = #tpu.dot_dimension_numbers<[1], [0], [0], [1], [0, 0, 1, 1], [], []>} : vector<16x512xbf16>, vector<512x512xbf16>, vector<16x512xf32> -> vector<16x512xf32>
    %5 = vector.broadcast %2 : vector<1x512xf32> to vector<16x512xf32>
    %6 = arith.addf %5, %4 : vector<16x512xf32>
    %cst_7 = arith.constant 0.000000e+00 : f32
    %7 = vector.broadcast %cst_7 : f32 to vector<16x512xf32>
    %8 = arith.subf %7, %6 : vector<16x512xf32>
    %9 = vector.extract_strided_slice %8 {offsets = [0, 0], sizes = [16, 128], strides = [1, 1]} : vector<16x512xf32> to vector<16x128xf32>
    %10 = vector.extract_strided_slice %8 {offsets = [0, 128], sizes = [16, 128], strides = [1, 1]} : vector<16x512xf32> to vector<16x128xf32>
    %11 = arith.maximumf %9, %10 : vector<16x128xf32>
    %12 = vector.extract_strided_slice %8 {offsets = [0, 256], sizes = [16, 128], strides = [1, 1]} : vector<16x512xf32> to vector<16x128xf32>
    %13 = arith.maximumf %11, %12 : vector<16x128xf32>
    %14 = vector.extract_strided_slice %8 {offsets = [0, 384], sizes = [16, 128], strides = [1, 1]} : vector<16x512xf32> to vector<16x128xf32>
    %15 = arith.maximumf %13, %14 : vector<16x128xf32>
    %cst_8 = arith.constant 0.000000e+00 : f32
    %16 = vector.broadcast %cst_8 : f32 to vector<16x128xf32>
    %cst_9 = arith.constant 0.000000e+00 : f32
    %17 = vector.broadcast %cst_9 : f32 to vector<16x128xf32>
    %cst_10 = arith.constant 0.000000e+00 : f32
    %18 = vector.broadcast %cst_10 : f32 to vector<16x128xf32>
    %19 = vector.extract_strided_slice %8 {offsets = [0, 0], sizes = [16, 128], strides = [1, 1]} : vector<16x512xf32> to vector<16x128xf32>
    %20 = arith.subf %19, %15 : vector<16x128xf32>
    %21 = math.exp %20 : vector<16x128xf32>
    %22 = arith.addf %16, %21 : vector<16x128xf32>
    %23 = vector.extract_strided_slice %0 {offsets = [0, 0], sizes = [16, 128], strides = [1, 1]} : vector<16x512xbf16> to vector<16x128xbf16>
    %24 = arith.extf %23 : vector<16x128xbf16> to vector<16x128xf32>
    %25 = arith.addf %17, %24 : vector<16x128xf32>
    %26 = arith.mulf %24, %20 : vector<16x128xf32>
    %27 = arith.subf %18, %26 : vector<16x128xf32>
    %28 = vector.extract_strided_slice %8 {offsets = [0, 128], sizes = [16, 128], strides = [1, 1]} : vector<16x512xf32> to vector<16x128xf32>
    %29 = arith.subf %28, %15 : vector<16x128xf32>
    %30 = math.exp %29 : vector<16x128xf32>
    %31 = arith.addf %22, %30 : vector<16x128xf32>
    %32 = vector.extract_strided_slice %0 {offsets = [0, 128], sizes = [16, 128], strides = [1, 1]} : vector<16x512xbf16> to vector<16x128xbf16>
    %33 = arith.extf %32 : vector<16x128xbf16> to vector<16x128xf32>
    %34 = arith.addf %25, %33 : vector<16x128xf32>
    %35 = arith.mulf %33, %29 : vector<16x128xf32>
    %36 = arith.subf %27, %35 : vector<16x128xf32>
    %37 = vector.extract_strided_slice %8 {offsets = [0, 256], sizes = [16, 128], strides = [1, 1]} : vector<16x512xf32> to vector<16x128xf32>
    %38 = arith.subf %37, %15 : vector<16x128xf32>
    %39 = math.exp %38 : vector<16x128xf32>
    %40 = arith.addf %31, %39 : vector<16x128xf32>
    %41 = vector.extract_strided_slice %0 {offsets = [0, 256], sizes = [16, 128], strides = [1, 1]} : vector<16x512xbf16> to vector<16x128xbf16>
    %42 = arith.extf %41 : vector<16x128xbf16> to vector<16x128xf32>
    %43 = arith.addf %34, %42 : vector<16x128xf32>
    %44 = arith.mulf %42, %38 : vector<16x128xf32>
    %45 = arith.subf %36, %44 : vector<16x128xf32>
    %46 = vector.extract_strided_slice %8 {offsets = [0, 384], sizes = [16, 128], strides = [1, 1]} : vector<16x512xf32> to vector<16x128xf32>
    %47 = arith.subf %46, %15 : vector<16x128xf32>
    %48 = math.exp %47 : vector<16x128xf32>
    %49 = arith.addf %40, %48 : vector<16x128xf32>
    %50 = vector.extract_strided_slice %0 {offsets = [0, 384], sizes = [16, 128], strides = [1, 1]} : vector<16x512xbf16> to vector<16x128xbf16>
    %51 = arith.extf %50 : vector<16x128xbf16> to vector<16x128xf32>
    %52 = arith.addf %43, %51 : vector<16x128xf32>
    %53 = arith.mulf %51, %47 : vector<16x128xf32>
    %54 = arith.subf %45, %53 : vector<16x128xf32>
    %55 = math.log %49 : vector<16x128xf32>
    %56 = arith.mulf %52, %55 : vector<16x128xf32>
    %57 = arith.addf %54, %56 : vector<16x128xf32>
    %cst_11 = arith.constant dense<0.000000e+00> : vector<16xf32>
    %58 = vector.multi_reduction <add>, %57, %cst_11 [1] : vector<16x128xf32> to vector<16xf32>
    %59 = vector.shape_cast %58 : vector<16xf32> to vector<16x1xf32>
    %60 = arith.mulf %59, %3 : vector<16x1xf32>
    %c0_12 = arith.constant 0 : index
    %c0_13 = arith.constant 0 : index
    %61 = vector.load %arg5[%c0_12, %c0_13] : memref<16x1xf32, #tpu.memory_space<vmem>>, vector<16x1xf32>
    tpu.vector_store %arg5[%c0_12, %c0_13], %60 {strides = array<i32>} : memref<16x1xf32, #tpu.memory_space<vmem>>, vector<16x1xf32>,
    return
  }
  func.func @transform_0(%arg0: i32) -> (i32, i32) {
    %c0_i32 = arith.constant 0 : i32
    %c0_i32_0 = arith.constant 0 : i32
    return %arg0, %c0_i32 : i32, i32
  }
  func.func @transform_1(%arg0: i32) -> (i32, i32) {
    %c0_i32 = arith.constant 0 : i32
    %c0_i32_0 = arith.constant 0 : i32
    %c0_i32_1 = arith.constant 0 : i32
    return %c0_i32, %c0_i32_0 : i32, i32
  }
  func.func @transform_2(%arg0: i32) -> (i32, i32) {
    %c0_i32 = arith.constant 0 : i32
    %c0_i32_0 = arith.constant 0 : i32
    %c0_i32_1 = arith.constant 0 : i32
    return %c0_i32, %c0_i32_0 : i32, i32
  }
  func.func @transform_3(%arg0: i32) -> (i32, i32) {
    %c0_i32 = arith.constant 0 : i32
    %c0_i32_0 = arith.constant 0 : i32
    return %arg0, %c0_i32 : i32, i32
  }
  func.func @transform_4(%arg0: i32) -> (i32, i32) {
    %c0_i32 = arith.constant 0 : i32
    %c0_i32_0 = arith.constant 0 : i32
    return %arg0, %c0_i32 : i32, i32
  }
}

</mosaic_0001>

<bundles_post_ra>
// kernel: tpu_custom_call.1
= control target key start
LH: loop header
LB: loop body
LE: loop exit
PB: predicated region body
PF: predicated region fallthrough
CT: control target
= control target key end

     0   :  { %9 = vsyncpa [#allocation3], 0  ;;  %s1636_s0 = inlined_call_operand.hbm [shape: bf16[16,512], index: 0, kind: input, shape index: {}]   ;;  %s1637_s1 = inlined_call_operand.hbm [shape: bf16[512,512], index: 1, kind: input, shape index: {}]   ;;  %s1638_s2 = inlined_call_operand.vmem [shape: f32[1,512], index: 2, kind: input, shape index: {}]   ;;  %s1639_s3 = inlined_call_operand.vmem [shape: f32[16,1], index: 3, kind: input, shape index: {}]   ;;  %s1640_s4 = inlined_call_operand.vmem [shape: f32[16,1], index: 4, kind: output, shape index: {}]  }
   0x1   :  { %10 = vsyncpa [#allocation5], 0  ;;  %s1546_s15 = smov [#allocation2]  }
   0x2   :  { %s16_s16 = sshll.u32 %s1546_s15, 4  ;;  %s17_s16 = int_to_ptr.vmem [resolvable:$true] %s16_s16 }
   0x3   :  { %s1510_s17 = scalar_lea.vmem %s17_s16, 512  ;;  %p1515_p1 = scmp.lt.s32.totalorder %s17_s16, %s17_s16 }
   0x4   :  { %p1511_p0 = scmp.ne.s32.totalorder %s17_s16, %s1510_s17  ;;  %p1516_p2 = scmp.lt.s32.totalorder %s1510_s17, %s1510_s17 }
   0x6   :  { %p1517_p3 = por %p1516_p2, %p1515_p1 }
   0x8   :  { %p1518_p4 = pnand %p1517_p3, %p1511_p0 }
   0xa   :  { %1521 = shalt.err (!%p1518_p4)
}
   0xb   :  { %s1547_s18 = smov 256   ;;  %s1548_s19 = smov 16  }
   0xc   :  { %22 = dma.hbm_to_vmem [thread:$0]  %s1636_s0, 512, %s17_s16, [#allocation3], %s1547_s18, %s1547_s18, %s1548_s19  }
   0xd   :  { %s1549_s22 = smov [#allocation4]  }
   0xe   :  { %s28_s23 = sshll.u32 %s1549_s22, 4  ;;  %s29_s23 = int_to_ptr.vmem [resolvable:$true] %s28_s23 }
   0xf   :  { %s1530_s24 = scalar_lea.vmem %s29_s23, 16384  ;;  %p1535_p6 = scmp.lt.s32.totalorder %s29_s23, %s29_s23 }
  0x10   :  { %p1531_p5 = scmp.ne.s32.totalorder %s29_s23, %s1530_s24  ;;  %p1536_p7 = scmp.lt.s32.totalorder %s1530_s24, %s1530_s24 }
  0x12   :  { %p1537_p8 = por %p1536_p7, %p1535_p6 }
  0x14   :  { %p1538_p9 = pnand %p1537_p8, %p1531_p5 }
  0x16   :  { %1541 = shalt.err (!%p1538_p9)
}
  0x17   :  { %34 = dma.hbm_to_vmem [thread:$0]  %s1637_s1, 16384, %s29_s23, [#allocation5], %s1547_s18, %s1547_s18, %s1548_s19  }
  0x18   :  { %1542 = dma.done.wait [#allocation3], 512  }
  0x19   :  { %1543 = vsyncadd [#allocation3], 4294966784 }
  0x1a   :  { %1544 = dma.done.wait [#allocation5], 16384  }
  0x1b   :  { %1545 = vsyncadd [#allocation5], 4294950912  ;;  %v1286_v0 = vld [vmem:[#allocation4 + $0xe4] ss:$16 sps:$4 sm:$0xff]   ;;  %v1290_v2 = vld [vmem:[#allocation4 + $0xe0] ss:$16 sps:$4 sm:$0xff]  }
  0x1c   :  { %v1288_v1 = vld [vmem:[#allocation4 + $0x2e4] ss:$16 sps:$4 sm:$0xff]   ;;  %840 = vmatprep.subr.bf16.mxu0 %v1286_v0  ;;  %v1291_v3 = vld [vmem:[#allocation4 + $0x2e0] ss:$16 sps:$4 sm:$0xff]   ;;  %v1585_v50 = vld [vmem:[#allocation2 + $0x8] sm:$0xff]  ;;  %vm1141_vm0 = vcmask 7168  }
  0x1d   :  { %883 = vmatprep.subr.bf16.mxu1 %v1288_v1  ;;  %v1292_v4 = vld [vmem:[#allocation4 + $0xc4] ss:$16 sps:$4 sm:$0xff]   ;;  %841 = vmatpush1.bf16.msra.mxu0 %v1290_v2  ;;  %v1296_v6 = vld [vmem:[#allocation4 + $0xc0] ss:$16 sps:$4 sm:$0xff]   ;;  %v1587_v51 = vld [vmem:[#allocation2 + $0x18] sm:$0xff] }
  0x1e   :  { %884 = vmatpush1.bf16.msra.mxu1 %v1291_v3  ;;  %v1294_v5 = vld [vmem:[#allocation4 + $0x2c4] ss:$16 sps:$4 sm:$0xff]   ;;  %842 = vmatprep.subr.bf16.mxu0 %v1292_v4  ;;  %v1297_v7 = vld [vmem:[#allocation4 + $0x2c0] ss:$16 sps:$4 sm:$0xff]   ;;  %v1153_v54 = vcombine.high %v1585_v50, %v1587_v51 }
  0x1f   :  { %885 = vmatprep.subr.bf16.mxu1 %v1294_v5  ;;  %v1298_v8 = vld [vmem:[#allocation4 + $0xa4] ss:$16 sps:$4 sm:$0xff]   ;;  %v1302_v10 = vld [vmem:[#allocation4 + $0xa0] ss:$16 sps:$4 sm:$0xff]  }
  0x20   :  { %v1300_v9 = vld [vmem:[#allocation4 + $0x2a4] ss:$16 sps:$4 sm:$0xff]   ;;  %v1303_v11 = vld [vmem:[#allocation4 + $0x2a0] ss:$16 sps:$4 sm:$0xff]   ;;  %915 = vmatprep.mubr.bf16.mxu1 %v1153_v54 }
  0x21   :  { %843 = vmatpush1.bf16.msra.mxu0 %v1296_v6  ;;  %v1304_v12 = vld [vmem:[#allocation4 + $0x84] ss:$16 sps:$4 sm:$0xff]   ;;  %v1308_v14 = vld [vmem:[#allocation4 + $0x80] ss:$16 sps:$4 sm:$0xff]   ;;  %v1388_v6 = vld [vmem:[#allocation4 + $0xec] ss:$16 sps:$4 sm:$0xff]  }
  0x22   :  { %886 = vmatpush1.bf16.msra.mxu1 %v1297_v7  ;;  %844 = vmatprep.subr.bf16.mxu0 %v1298_v8  ;;  %v1306_v13 = vld [vmem:[#allocation4 + $0x284] ss:$16 sps:$4 sm:$0xff]   ;;  %v1309_v15 = vld [vmem:[#allocation4 + $0x280] ss:$16 sps:$4 sm:$0xff]   ;;  %v1391_v7 = vld [vmem:[#allocation4 + $0x2ec] ss:$16 sps:$4 sm:$0xff]  }
  0x23   :  { %887 = vmatprep.subr.bf16.mxu1 %v1300_v9  ;;  %v1310_v16 = vld [vmem:[#allocation4 + $0x64] ss:$16 sps:$4 sm:$0xff]   ;;  %v1314_v18 = vld [vmem:[#allocation4 + $0x60] ss:$16 sps:$4 sm:$0xff]   ;;  %v1599_v9 = vcombine.low %v1585_v50, %v1587_v51 }
  0x24   :  { %v1312_v17 = vld [vmem:[#allocation4 + $0x264] ss:$16 sps:$4 sm:$0xff]   ;;  %v1315_v19 = vld [vmem:[#allocation4 + $0x260] ss:$16 sps:$4 sm:$0xff]  }
  0x25   :  { %845 = vmatpush1.bf16.msra.mxu0 %v1302_v10  ;;  %v1316_v20 = vld [vmem:[#allocation4 + $0x44] ss:$16 sps:$4 sm:$0xff]   ;;  %v1320_v22 = vld [vmem:[#allocation4 + $0x40] ss:$16 sps:$4 sm:$0xff]   ;;  %v1386_v10 = vld [vmem:[#allocation4 + $0xe8] ss:$16 sps:$4 sm:$0xff]  }
  0x26   :  { %888 = vmatpush1.bf16.msra.mxu1 %v1303_v11  ;;  %846 = vmatprep.subr.bf16.mxu0 %v1304_v12  ;;  %v1318_v21 = vld [vmem:[#allocation4 + $0x244] ss:$16 sps:$4 sm:$0xff]   ;;  %v1321_v23 = vld [vmem:[#allocation4 + $0x240] ss:$16 sps:$4 sm:$0xff]   ;;  %v1389_v11 = vld [vmem:[#allocation4 + $0x2e8] ss:$16 sps:$4 sm:$0xff]  }
  0x27   :  { %889 = vmatprep.subr.bf16.mxu1 %v1306_v13  ;;  %v1322_v24 = vld [vmem:[#allocation4 + $0x24] ss:$16 sps:$4 sm:$0xff]   ;;  %v1326_v26 = vld [vmem:[#allocation4 + $0x20] ss:$16 sps:$4 sm:$0xff]   ;;  %v1394_v12 = vld [vmem:[#allocation4 + $0xcc] ss:$16 sps:$4 sm:$0xff]  }
  0x28   :  { %v1324_v25 = vld [vmem:[#allocation4 + $0x224] ss:$16 sps:$4 sm:$0xff]   ;;  %v1327_v27 = vld [vmem:[#allocation4 + $0x220] ss:$16 sps:$4 sm:$0xff]   ;;  %v1397_v13 = vld [vmem:[#allocation4 + $0x2cc] ss:$16 sps:$4 sm:$0xff]  }
  0x29   :  { %847 = vmatpush1.bf16.msra.mxu0 %v1308_v14  ;;  %v1328_v28 = vld [vmem:[#allocation4 + $0x4] ss:$16 sps:$4 sm:$0xff]   ;;  %v1332_v30 = vld [vmem:[#allocation4] ss:$16 sps:$4 sm:$0xff]   ;;  %v1392_v14 = vld [vmem:[#allocation4 + $0xc8] ss:$16 sps:$4 sm:$0xff]  }
  0x2a   :  { %890 = vmatpush1.bf16.msra.mxu1 %v1309_v15  ;;  %848 = vmatprep.subr.bf16.mxu0 %v1310_v16  ;;  %v1330_v29 = vld [vmem:[#allocation4 + $0x204] ss:$16 sps:$4 sm:$0xff]   ;;  %v1333_v31 = vld [vmem:[#allocation4 + $0x200] ss:$16 sps:$4 sm:$0xff]   ;;  %v1395_v15 = vld [vmem:[#allocation4 + $0x2c8] ss:$16 sps:$4 sm:$0xff]  }
  0x2b   :  { %891 = vmatprep.subr.bf16.mxu1 %v1312_v17  ;;  %v1334_v32 = vld [vmem:[#allocation4 + $0x1e4] ss:$16 sps:$4 sm:$0xff]   ;;  %v1338_v34 = vld [vmem:[#allocation4 + $0x1e0] ss:$16 sps:$4 sm:$0xff]   ;;  %v1400_v16 = vld [vmem:[#allocation4 + $0xac] ss:$16 sps:$4 sm:$0xff]  }
  0x2c   :  { %v1336_v33 = vld [vmem:[#allocation4 + $0x3e4] ss:$16 sps:$4 sm:$0xff]   ;;  %v1339_v35 = vld [vmem:[#allocation4 + $0x3e0] ss:$16 sps:$4 sm:$0xff]   ;;  %v1403_v17 = vld [vmem:[#allocation4 + $0x2ac] ss:$16 sps:$4 sm:$0xff]  }
  0x2d   :  { %849 = vmatpush1.bf16.msra.mxu0 %v1314_v18  ;;  %v1340_v36 = vld [vmem:[#allocation4 + $0x1c4] ss:$16 sps:$4 sm:$0xff]   ;;  %v1344_v38 = vld [vmem:[#allocation4 + $0x1c0] ss:$16 sps:$4 sm:$0xff]   ;;  %v1398_v18 = vld [vmem:[#allocation4 + $0xa8] ss:$16 sps:$4 sm:$0xff]  }
  0x2e   :  { %892 = vmatpush1.bf16.msra.mxu1 %v1315_v19  ;;  %850 = vmatprep.subr.bf16.mxu0 %v1316_v20  ;;  %v1342_v37 = vld [vmem:[#allocation4 + $0x3c4] ss:$16 sps:$4 sm:$0xff]   ;;  %v1345_v39 = vld [vmem:[#allocation4 + $0x3c0] ss:$16 sps:$4 sm:$0xff]   ;;  %v1401_v19 = vld [vmem:[#allocation4 + $0x2a8] ss:$16 sps:$4 sm:$0xff]  }
  0x2f   :  { %893 = vmatprep.subr.bf16.mxu1 %v1318_v21  ;;  %v1346_v40 = vld [vmem:[#allocation4 + $0x1a4] ss:$16 sps:$4 sm:$0xff]   ;;  %v1350_v42 = vld [vmem:[#allocation4 + $0x1a0] ss:$16 sps:$4 sm:$0xff]   ;;  %v1406_v20 = vld [vmem:[#allocation4 + $0x8c] ss:$16 sps:$4 sm:$0xff]  }
  0x30   :  { %v1348_v41 = vld [vmem:[#allocation4 + $0x3a4] ss:$16 sps:$4 sm:$0xff]   ;;  %v1351_v43 = vld [vmem:[#allocation4 + $0x3a0] ss:$16 sps:$4 sm:$0xff]   ;;  %v1409_v21 = vld [vmem:[#allocation4 + $0x28c] ss:$16 sps:$4 sm:$0xff]  }
  0x31   :  { %851 = vmatpush1.bf16.msra.mxu0 %v1320_v22  ;;  %v1352_v44 = vld [vmem:[#allocation4 + $0x184] ss:$16 sps:$4 sm:$0xff]   ;;  %v1356_v46 = vld [vmem:[#allocation4 + $0x180] ss:$16 sps:$4 sm:$0xff]   ;;  %v1404_v22 = vld [vmem:[#allocation4 + $0x88] ss:$16 sps:$4 sm:$0xff]  }
  0x32   :  { %894 = vmatpush1.bf16.msra.mxu1 %v1321_v23  ;;  %852 = vmatprep.subr.bf16.mxu0 %v1322_v24  ;;  %v1354_v45 = vld [vmem:[#allocation4 + $0x384] ss:$16 sps:$4 sm:$0xff]   ;;  %v1357_v47 = vld [vmem:[#allocation4 + $0x380] ss:$16 sps:$4 sm:$0xff]   ;;  %v1407_v23 = vld [vmem:[#allocation4 + $0x288] ss:$16 sps:$4 sm:$0xff]  }
  0x33   :  { %895 = vmatprep.subr.bf16.mxu1 %v1324_v25  ;;  %v1581_v48 = vld [vmem:[#allocation2] sm:$0xff]  ;;  %v1583_v49 = vld [vmem:[#allocation2 + $0x10] sm:$0xff]  ;;  %v1412_v24 = vld [vmem:[#allocation4 + $0x6c] ss:$16 sps:$4 sm:$0xff]  }
  0x34   :  { %v1358_v52 = vld [vmem:[#allocation4 + $0x164] ss:$16 sps:$4 sm:$0xff]   ;;  %v1151_v53 = vcombine.high %v1581_v48, %v1583_v49  ;;  %v1362_v56 = vld [vmem:[#allocation4 + $0x160] ss:$16 sps:$4 sm:$0xff]   ;;  %v1595_v8 = vcombine.low %v1581_v48, %v1583_v49  ;;  %v1415_v25 = vld [vmem:[#allocation4 + $0x26c] ss:$16 sps:$4 sm:$0xff]  }
  0x35   :  { %853 = vmatpush1.bf16.msra.mxu0 %v1326_v26  ;;  %v1360_v55 = vld [vmem:[#allocation4 + $0x364] ss:$16 sps:$4 sm:$0xff]   ;;  %v1363_v57 = vld [vmem:[#allocation4 + $0x360] ss:$16 sps:$4 sm:$0xff]   ;;  %v1410_v26 = vld [vmem:[#allocation4 + $0x68] ss:$16 sps:$4 sm:$0xff]  }
  0x36   :  { %896 = vmatpush1.bf16.msra.mxu1 %v1327_v27  ;;  %854 = vmatprep.subr.bf16.mxu0 %v1328_v28  ;;  %v1364_v58 = vld [vmem:[#allocation4 + $0x144] ss:$16 sps:$4 sm:$0xff]   ;;  %v1368_v60 = vld [vmem:[#allocation4 + $0x140] ss:$16 sps:$4 sm:$0xff]   ;;  %v1413_v27 = vld [vmem:[#allocation4 + $0x268] ss:$16 sps:$4 sm:$0xff]  }
  0x37   :  { %897 = vmatprep.subr.bf16.mxu1 %v1330_v29  ;;  %872 = vmatprep.mubr.bf16.mxu0 %v1151_v53  ;;  %v1366_v59 = vld [vmem:[#allocation4 + $0x344] ss:$16 sps:$4 sm:$0xff]   ;;  %v1369_v61 = vld [vmem:[#allocation4 + $0x340] ss:$16 sps:$4 sm:$0xff]   ;;  %v1418_v28 = vld [vmem:[#allocation4 + $0x4c] ss:$16 sps:$4 sm:$0xff]  }
  0x38   :  { %v1370_v62 = vld [vmem:[#allocation4 + $0x124] ss:$16 sps:$4 sm:$0xff]   ;;  %v1374_v0 = vld [vmem:[#allocation4 + $0x120] ss:$16 sps:$4 sm:$0xff]   ;;  %v1421_v29 = vld [vmem:[#allocation4 + $0x24c] ss:$16 sps:$4 sm:$0xff]  }
  0x39   :  { %855 = vmatpush1.bf16.msra.mxu0 %v1332_v30  ;;  %v1372_v63 = vld [vmem:[#allocation4 + $0x324] ss:$16 sps:$4 sm:$0xff]   ;;  %v1375_v1 = vld [vmem:[#allocation4 + $0x320] ss:$16 sps:$4 sm:$0xff]   ;;  %v1416_v30 = vld [vmem:[#allocation4 + $0x48] ss:$16 sps:$4 sm:$0xff]  }
  0x3a   :  { %898 = vmatpush1.bf16.msra.mxu1 %v1333_v31  ;;  %856 = vmatprep.subr.bf16.mxu0 %v1334_v32  ;;  %v1376_v2 = vld [vmem:[#allocation4 + $0x104] ss:$16 sps:$4 sm:$0xff]   ;;  %v1380_v4 = vld [vmem:[#allocation4 + $0x100] ss:$16 sps:$4 sm:$0xff]   ;;  %v1419_v31 = vld [vmem:[#allocation4 + $0x248] ss:$16 sps:$4 sm:$0xff]  }
  0x3b   :  { %899 = vmatprep.subr.bf16.mxu1 %v1336_v33  ;;  %v1378_v3 = vld [vmem:[#allocation4 + $0x304] ss:$16 sps:$4 sm:$0xff]   ;;  %v1381_v5 = vld [vmem:[#allocation4 + $0x300] ss:$16 sps:$4 sm:$0xff]   ;;  %v1424_v32 = vld [vmem:[#allocation4 + $0x2c] ss:$16 sps:$4 sm:$0xff]  }
  0x3c   :  { %v1427_v33 = vld [vmem:[#allocation4 + $0x22c] ss:$16 sps:$4 sm:$0xff]  }
  0x3d   :  { %857 = vmatpush2.bf16.msra.mxu0 %v1338_v34  ;;  %v1422_v34 = vld [vmem:[#allocation4 + $0x28] ss:$16 sps:$4 sm:$0xff]  }
  0x3e   :  { %900 = vmatpush2.bf16.msra.mxu1 %v1339_v35  ;;  %858 = vmatprep.subr.bf16.mxu0 %v1340_v36  ;;  %v1425_v35 = vld [vmem:[#allocation4 + $0x228] ss:$16 sps:$4 sm:$0xff]   ;;  %v1430_v36 = vld [vmem:[#allocation4 + $0xc] ss:$16 sps:$4 sm:$0xff]  }
  0x3f   :  { %901 = vmatprep.subr.bf16.mxu1 %v1342_v37  ;;  %v1433_v37 = vld [vmem:[#allocation4 + $0x20c] ss:$16 sps:$4 sm:$0xff]  }
  0x41   :  { %859 = vmatpush2.bf16.msra.mxu0 %v1344_v38  ;;  %v1428_v38 = vld [vmem:[#allocation4 + $0x8] ss:$16 sps:$4 sm:$0xff]  }
  0x42   :  { %902 = vmatpush2.bf16.msra.mxu1 %v1345_v39  ;;  %860 = vmatprep.subr.bf16.mxu0 %v1346_v40  ;;  %v1431_v39 = vld [vmem:[#allocation4 + $0x208] ss:$16 sps:$4 sm:$0xff]   ;;  %v1436_v40 = vld [vmem:[#allocation4 + $0x1ec] ss:$16 sps:$4 sm:$0xff]  }
  0x43   :  { %903 = vmatprep.subr.bf16.mxu1 %v1348_v41  ;;  %v1439_v41 = vld [vmem:[#allocation4 + $0x3ec] ss:$16 sps:$4 sm:$0xff]  }
  0x45   :  { %861 = vmatpush2.bf16.msra.mxu0 %v1350_v42  ;;  %v1434_v42 = vld [vmem:[#allocation4 + $0x1e8] ss:$16 sps:$4 sm:$0xff]  }
  0x46   :  { %904 = vmatpush2.bf16.msra.mxu1 %v1351_v43  ;;  %862 = vmatprep.subr.bf16.mxu0 %v1352_v44  ;;  %v1437_v43 = vld [vmem:[#allocation4 + $0x3e8] ss:$16 sps:$4 sm:$0xff]   ;;  %v1442_v44 = vld [vmem:[#allocation4 + $0x1cc] ss:$16 sps:$4 sm:$0xff]  }
  0x47   :  { %905 = vmatprep.subr.bf16.mxu1 %v1354_v45  ;;  %v1445_v45 = vld [vmem:[#allocation4 + $0x3cc] ss:$16 sps:$4 sm:$0xff]  }
  0x49   :  { %863 = vmatpush2.bf16.msra.mxu0 %v1356_v46  ;;  %v1440_v46 = vld [vmem:[#allocation4 + $0x1c8] ss:$16 sps:$4 sm:$0xff]  }
  0x4a   :  { %906 = vmatpush2.bf16.msra.mxu1 %v1357_v47  ;;  %864 = vmatprep.subr.bf16.mxu0 %v1358_v52  ;;  %v1443_v47 = vld [vmem:[#allocation4 + $0x3c8] ss:$16 sps:$4 sm:$0xff]   ;;  %v1448_v52 = vld [vmem:[#allocation4 + $0x1ac] ss:$16 sps:$4 sm:$0xff]  }
  0x4b   :  { %907 = vmatprep.subr.bf16.mxu1 %v1360_v55  ;;  %v1449_v55 = vld [vmem:[#allocation4 + $0x3a8] ss:$16 sps:$4 sm:$0xff]  }
  0x4d   :  { %865 = vmatpush2.bf16.msra.mxu0 %v1362_v56  ;;  %v1454_v56 = vld [vmem:[#allocation4 + $0x18c] ss:$16 sps:$4 sm:$0xff]  }
  0x4e   :  { %908 = vmatpush2.bf16.msra.mxu1 %v1363_v57  ;;  %866 = vmatprep.subr.bf16.mxu0 %v1364_v58  ;;  %v1457_v57 = vld [vmem:[#allocation4 + $0x38c] ss:$16 sps:$4 sm:$0xff]   ;;  %v1452_v58 = vld [vmem:[#allocation4 + $0x188] ss:$16 sps:$4 sm:$0xff]  }
  0x4f   :  { %909 = vmatprep.subr.bf16.mxu1 %v1366_v59  ;;  %v1455_v59 = vld [vmem:[#allocation4 + $0x388] ss:$16 sps:$4 sm:$0xff]  }
  0x51   :  { %867 = vmatpush2.bf16.msra.mxu0 %v1368_v60  ;;  %v1460_v60 = vld [vmem:[#allocation4 + $0x16c] ss:$16 sps:$4 sm:$0xff]  }
  0x52   :  { %910 = vmatpush2.bf16.msra.mxu1 %v1369_v61  ;;  %868 = vmatprep.subr.bf16.mxu0 %v1370_v62  ;;  %v1463_v61 = vld [vmem:[#allocation4 + $0x36c] ss:$16 sps:$4 sm:$0xff]   ;;  %v1458_v62 = vld [vmem:[#allocation4 + $0x168] ss:$16 sps:$4 sm:$0xff]  }
  0x53   :  { %911 = vmatprep.subr.bf16.mxu1 %v1372_v63  ;;  %v1461_v63 = vld [vmem:[#allocation4 + $0x368] ss:$16 sps:$4 sm:$0xff]  }
  0x55   :  { %869 = vmatpush2.bf16.msra.mxu0 %v1374_v0  ;;  %v1466_v0 = vld [vmem:[#allocation4 + $0x14c] ss:$16 sps:$4 sm:$0xff]  }
  0x56   :  { %912 = vmatpush2.bf16.msra.mxu1 %v1375_v1  ;;  %870 = vmatprep.subr.bf16.mxu0 %v1376_v2  ;;  %v1469_v1 = vld [vmem:[#allocation4 + $0x34c] ss:$16 sps:$4 sm:$0xff]   ;;  %v1464_v2 = vld [vmem:[#allocation4 + $0x148] ss:$16 sps:$4 sm:$0xff]  }
  0x57   :  { %913 = vmatprep.subr.bf16.mxu1 %v1378_v3  ;;  %v1467_v3 = vld [vmem:[#allocation4 + $0x348] ss:$16 sps:$4 sm:$0xff]  }
  0x59   :  { %871 = vmatpush2.bf16.msra.mxu0 %v1380_v4  ;;  %v1472_v4 = vld [vmem:[#allocation4 + $0x12c] ss:$16 sps:$4 sm:$0xff]  }
  0x5a   :  { %914 = vmatpush2.bf16.msra.mxu1 %v1381_v5  ;;  %926 = vmatprep.subr.bf16.mxu0 %v1388_v6  ;;  %v1475_v5 = vld [vmem:[#allocation4 + $0x32c] ss:$16 sps:$4 sm:$0xff]   ;;  %v1470_v6 = vld [vmem:[#allocation4 + $0x128] ss:$16 sps:$4 sm:$0xff]  }
  0x5b   :  { %969 = vmatprep.subr.bf16.mxu1 %v1391_v7  ;;  %v1473_v7 = vld [vmem:[#allocation4 + $0x328] ss:$16 sps:$4 sm:$0xff]  }
  0x5c   :  { %873 = vmatmul.mubr.bf16.vlgmr.msra.gmra.mxu0 %v1595_v8 }
  0x5d   :  { %916 = vmatmul.mubr.bf16.vlgmr.msra.gmra.mxu1 %v1599_v9  ;;  %927 = vmatpush1.bf16.msra.mxu0 %v1386_v10  ;;  %v1478_v10 = vld [vmem:[#allocation4 + $0x10c] ss:$16 sps:$4 sm:$0xff]  }
  0x5e   :  { %970 = vmatpush1.bf16.msra.mxu1 %v1389_v11  ;;  %928 = vmatprep.subr.bf16.mxu0 %v1394_v12  ;;  %v1481_v11 = vld [vmem:[#allocation4 + $0x30c] ss:$16 sps:$4 sm:$0xff]   ;;  %v1476_v12 = vld [vmem:[#allocation4 + $0x108] ss:$16 sps:$4 sm:$0xff]  }
  0x5f   :  { %971 = vmatprep.subr.bf16.mxu1 %v1397_v13  ;;  %958 = vmatprep.mubr.bf16.mxu0 %v1151_v53  ;;  %v1451_v53 = vld [vmem:[#allocation4 + $0x3ac] ss:$16 sps:$4 sm:$0xff]   ;;  %v1479_v13 = vld [vmem:[#allocation4 + $0x308] ss:$16 sps:$4 sm:$0xff]  }
  0x60   :  { %1001 = vmatprep.mubr.bf16.mxu1 %v1153_v54  ;;  %v1446_v54 = vld [vmem:[#allocation4 + $0x1a8] ss:$16 sps:$4 sm:$0xff]  }
  0x61   :  { %929 = vmatpush1.bf16.msra.mxu0 %v1392_v14  ;;  %v1013_v14 = vlaneseq }
  0x62   :  { %972 = vmatpush1.bf16.msra.mxu1 %v1395_v15  ;;  %930 = vmatprep.subr.bf16.mxu0 %v1400_v16 }
  0x63   :  { %973 = vmatprep.subr.bf16.mxu1 %v1403_v17  ;;  %v1014_v17 = vshrl.u32 %v1013_v14, 7 }
  0x65   :  { %931 = vmatpush1.bf16.msra.mxu0 %v1398_v18 }
  0x66   :  { %974 = vmatpush1.bf16.msra.mxu1 %v1401_v19  ;;  %932 = vmatprep.subr.bf16.mxu0 %v1406_v20  ;;  %v1015_v20 = vsub.s32 0, %v1014_v17 }
  0x67   :  { %975 = vmatprep.subr.bf16.mxu1 %v1409_v21  ;;  %v1019_v21 = vsub.s32 1, %v1014_v17 }
  0x69   :  { %933 = vmatpush1.bf16.msra.mxu0 %v1404_v22  ;;  %v177_v22 = vld [vmem:[%s1638_s2] sm:$0xf] }
  0x6a   :  { %976 = vmatpush1.bf16.msra.mxu1 %v1407_v23  ;;  %934 = vmatprep.subr.bf16.mxu0 %v1412_v24 }
  0x6b   :  { %977 = vmatprep.subr.bf16.mxu1 %v1415_v25 }
  0x6d   :  { %935 = vmatpush1.bf16.msra.mxu0 %v1410_v26  ;;  %v1016_v26 = vrot.slane %v177_v22, %v1015_v20 }
  0x6e   :  { %978 = vmatpush1.bf16.msra.mxu1 %v1413_v27  ;;  %936 = vmatprep.subr.bf16.mxu0 %v1418_v28 }
  0x6f   :  { %979 = vmatprep.subr.bf16.mxu1 %v1421_v29  ;;  %v1023_v29 = vsub.s32 2, %v1014_v17 }
  0x71   :  { %937 = vmatpush1.bf16.msra.mxu0 %v1416_v30 }
  0x72   :  { %980 = vmatpush1.bf16.msra.mxu1 %v1419_v31  ;;  %938 = vmatprep.subr.bf16.mxu0 %v1424_v32 }
  0x73   :  { %981 = vmatprep.subr.bf16.mxu1 %v1427_v33  ;;  %v1027_v33 = vsub.s32 3, %v1014_v17 }
  0x75   :  { %939 = vmatpush1.bf16.msra.mxu0 %v1422_v34 }
  0x76   :  { %982 = vmatpush1.bf16.msra.mxu1 %v1425_v35  ;;  %940 = vmatprep.subr.bf16.mxu0 %v1430_v36  ;;  %v1024_v35 = vrot.slane %v177_v22, %v1023_v29 }
  0x77   :  { %983 = vmatprep.subr.bf16.mxu1 %v1433_v37 }
  0x79   :  { %941 = vmatpush1.bf16.msra.mxu0 %v1428_v38 }
  0x7a   :  { %984 = vmatpush1.bf16.msra.mxu1 %v1431_v39  ;;  %942 = vmatprep.subr.bf16.mxu0 %v1436_v40 }
  0x7b   :  { %985 = vmatprep.subr.bf16.mxu1 %v1439_v41 }
  0x7d   :  { %943 = vmatpush2.bf16.msra.mxu0 %v1434_v42  ;;  %v1028_v42 = vrot.slane %v177_v22, %v1027_v33 }
  0x7e   :  { %986 = vmatpush2.bf16.msra.mxu1 %v1437_v43  ;;  %944 = vmatprep.subr.bf16.mxu0 %v1442_v44 }
  0x7f   :  { %987 = vmatprep.subr.bf16.mxu1 %v1445_v45 }
  0x81   :  { %945 = vmatpush2.bf16.msra.mxu0 %v1440_v46 }
  0x82   :  { %988 = vmatpush2.bf16.msra.mxu1 %v1443_v47  ;;  %946 = vmatprep.subr.bf16.mxu0 %v1448_v52 }
  0x83   :  { %989 = vmatprep.subr.bf16.mxu1 %v1451_v53 }
  0x85   :  { %947 = vmatpush2.bf16.msra.mxu0 %v1446_v54 }
  0x86   :  { %990 = vmatpush2.bf16.msra.mxu1 %v1449_v55  ;;  %948 = vmatprep.subr.bf16.mxu0 %v1454_v56 }
  0x87   :  { %991 = vmatprep.subr.bf16.mxu1 %v1457_v57 }
  0x89   :  { %949 = vmatpush2.bf16.msra.mxu0 %v1452_v58 }
  0x8a   :  { %992 = vmatpush2.bf16.msra.mxu1 %v1455_v59  ;;  %950 = vmatprep.subr.bf16.mxu0 %v1460_v60 }
  0x8b   :  { %993 = vmatprep.subr.bf16.mxu1 %v1463_v61 }
  0x8d   :  { %951 = vmatpush2.bf16.msra.mxu0 %v1458_v62 }
  0x8e   :  { %994 = vmatpush2.bf16.msra.mxu1 %v1461_v63  ;;  %952 = vmatprep.subr.bf16.mxu0 %v1466_v0 }
  0x8f   :  { %995 = vmatprep.subr.bf16.mxu1 %v1469_v1 }
  0x91   :  { %953 = vmatpush2.bf16.msra.mxu0 %v1464_v2 }
  0x92   :  { %996 = vmatpush2.bf16.msra.mxu1 %v1467_v3  ;;  %954 = vmatprep.subr.bf16.mxu0 %v1472_v4 }
  0x93   :  { %997 = vmatprep.subr.bf16.mxu1 %v1475_v5 }
  0x95   :  { %955 = vmatpush2.bf16.msra.mxu0 %v1470_v6 }
  0x96   :  { %998 = vmatpush2.bf16.msra.mxu1 %v1473_v7  ;;  %956 = vmatprep.subr.bf16.mxu0 %v1478_v10 }
  0x97   :  { %999 = vmatprep.subr.bf16.mxu1 %v1481_v11 }
  0x99   :  { %957 = vmatpush2.bf16.msra.mxu0 %v1476_v12 }
  0x9a   :  { %1000 = vmatpush2.bf16.msra.mxu1 %v1479_v13 }
  0x9c   :  { %959 = vmatmul.mubr.bf16.vlgmr.msra.gmra.mxu0 %v1595_v8  ;;  %v1020_v8 = vrot.slane %v177_v22, %v1019_v21 }
  0x9d   :  { %1002 = vmatmul.mubr.bf16.vlgmr.msra.gmra.mxu1 %v1599_v9 }
 0x11c   :  { %v874_v15 = vpop.f32.mrf.mxu0 }
 0x11d   :  { %v917_v16 = vpop.f32.mrf.mxu1 }
 0x11e   :  { %v876_v18 = vpop.f32.mrf.mxu0  ;;  %v918_v25 = vadd.f32 %v917_v16, %v874_v15 }
 0x11f   :  { %v919_v19 = vpop.f32.mrf.mxu1 }
 0x120   :  { %v878_v23 = vpop.f32.mrf.mxu0  ;;  %v920_v27 = vadd.f32 %v919_v19, %v876_v18  ;;  %v1033_v30 = vadd.f32 %v1016_v26, %v918_v25 }
 0x121   :  { %v921_v24 = vpop.f32.mrf.mxu1 }
 0x122   :  { %v880_v28 = vpop.f32.mrf.mxu0  ;;  %v1034_v31 = vadd.f32 %v1020_v8, %v920_v27  ;;  %v922_v34 = vadd.f32 %v921_v24, %v878_v23  ;;  %v1041_v36 = vsub.f32 0.0, %v1033_v30 }
 0x123   :  { %v923_v9 = vpop.f32.mrf.mxu1 }
 0x124   :  { %v924_v32 = vadd.f32 %v923_v9, %v880_v28  ;;  %v1042_v37 = vsub.f32 0.0, %v1034_v31  ;;  %v1037_v43 = vadd.f32 %v1016_v26, %v922_v34  ;;  %v1063_v31 = vunpack.c.l.bf16 %v1581_v48 }
 0x125   :  { %v1079_v34 = vrot.slane %v1581_v48, 4 }
 0x126   :  { %v1038_v40 = vadd.f32 %v1020_v8, %v924_v32  ;;  %v1049_v52 = vmax.f32 %v1041_v36, %v1042_v37  ;;  %v1045_v59 = vsub.f32 0.0, %v1037_v43 }
 0x127   :  { %v1083_v43 = vunpack.c.l.bf16 %v1079_v34 }
 0x128   :  { %v1046_v55 = vsub.f32 0.0, %v1038_v40 }
 0x12a   :  { %v1050_v2 = vmax.f32 %v1045_v59, %v1046_v55 }
 0x15c   :  { %v960_v38 = vpop.f32.mrf.mxu0 }
 0x15d   :  { %v1003_v39 = vpop.f32.mrf.mxu1 }
 0x15e   :  { %v1004_v41 = vadd.f32 %v1003_v39, %v960_v38  ;;  %v962_v44 = vpop.f32.mrf.mxu0  ;;  %v1064_v38 = vunpack.c.l.bf16 %v1583_v49 }
 0x15f   :  { %v1005_v45 = vpop.f32.mrf.mxu1 }
 0x160   :  { %v1035_v46 = vadd.f32 %v1024_v35, %v1004_v41  ;;  %v1006_v47 = vadd.f32 %v1005_v45, %v962_v44  ;;  %v964_v53 = vpop.f32.mrf.mxu0 }
 0x161   :  { %v1007_v54 = vpop.f32.mrf.mxu1 }
 0x162   :  { %v1043_v56 = vsub.f32 0.0, %v1035_v46  ;;  %v1036_v57 = vadd.f32 %v1028_v42, %v1006_v47  ;;  %v1008_v58 = vadd.f32 %v1007_v54, %v964_v53  ;;  %v966_v60 = vpop.f32.mrf.mxu0  ;;  %v1085_v46 = vadd.f32 %v1083_v43, %v1063_v31 }
 0x163   :  { %v1009_v61 = vpop.f32.mrf.mxu1  ;;  %v1099_v54 = vunpack.c.l.bf16 %v1585_v50 }
 0x164   :  { %v1051_v62 = vmax.f32 %v1049_v52, %v1043_v56  ;;  %v1044_v63 = vsub.f32 0.0, %v1036_v57  ;;  %v1039_v0 = vadd.f32 %v1024_v35, %v1008_v58  ;;  %v1010_v1 = vadd.f32 %v1009_v61, %v966_v60 }
 0x165   :  { %v1115_v52 = vrot.slane %v1585_v50, 4 }
 0x166   :  { %v1053_v3 = vmax.f32 %v1051_v62, %v1044_v63  ;;  %v1047_v4 = vsub.f32 0.0, %v1039_v0  ;;  %v1040_v5 = vadd.f32 %v1028_v42, %v1010_v1  ;;  %v1080_v42 = vrot.slane %v1583_v49, 4 }
 0x167   :  { %v1100_v49 = vunpack.c.l.bf16 %v1587_v51  ;;  %v1116_v62 = vrot.slane %v1587_v51, 4 }
 0x168   :  { %v1608_v6 = vsub.f32 %v1044_v63, %v1053_v3  ;;  %v1052_v7 = vmax.f32 %v1050_v2, %v1047_v4  ;;  %v1048_v10 = vsub.f32 0.0, %v1040_v5  ;;  %v1055_v11 = vsub.f32 %v1041_v36, %v1053_v3 }
 0x169   :  { %v1071_v12 = vsub.f32 %v1042_v37, %v1053_v3  ;;  %v1091_v13 = vsub.f32 %v1043_v56, %v1053_v3  ;;  %v1084_v48 = vunpack.c.l.bf16 %v1080_v42  ;;  %v1101_v56 = vadd.f32 %v1099_v54, %v1085_v46 }
 0x16a   :  { %v1054_v14 = vmax.f32 %v1052_v7, %v1048_v10  ;;  %v1057_v15 = vmul.f32 1.442695, %v1055_v11  ;;  %v1109_v16 = vmul.f32 1.442695, %v1608_v6  ;;  %v1067_v39 = vmul.f32 %v1063_v31, %v1055_v11 }
 0x16b   :  { %v1073_v17 = vmul.f32 1.442695, %v1071_v12  ;;  %v1093_v18 = vmul.f32 1.442695, %v1091_v13  ;;  %v1087_v53 = vmul.f32 %v1083_v43, %v1071_v12  ;;  %v1086_v58 = vadd.f32 %v1084_v48, %v1064_v38 }
 0x16c   :  { %1482 = vpow2.f32 %v1057_v15  ;;  %v1056_v19 = vsub.f32 %v1045_v59, %v1054_v14  ;;  %v1072_v20 = vsub.f32 %v1046_v55, %v1054_v14  ;;  %v1092_v21 = vsub.f32 %v1047_v4, %v1054_v14 }
 0x16d   :  { %v1611_v22 = vsub.f32 %v1048_v10, %v1054_v14  ;;  %1484 = vpow2.f32 %v1073_v17  ;;  %v1069_v45 = vsub.f32 0.0, %v1067_v39  ;;  %v1119_v59 = vunpack.c.l.bf16 %v1115_v52 }
 0x16e   :  { %1486 = vpow2.f32 %v1109_v16  ;;  %v1059_v23 = vmul.f32 1.442695, %v1056_v19  ;;  %v1075_v24 = vmul.f32 1.442695, %v1072_v20  ;;  %v1095_v25 = vmul.f32 1.442695, %v1092_v21 }
 0x16f   :  { %1488 = vpow2.f32 %v1093_v18  ;;  %v1111_v26 = vmul.f32 1.442695, %v1611_v22  ;;  %v1068_v47 = vmul.f32 %v1064_v38, %v1056_v19  ;;  %v1089_v55 = vsub.f32 %v1069_v45, %v1087_v53 }
 0x170   :  { %1490 = vpow2.f32 %v1059_v23  ;;  %v1103_v60 = vmul.f32 %v1099_v54, %v1091_v13  ;;  %v1088_v61 = vmul.f32 %v1084_v48, %v1072_v20  ;;  %v1121_v0 = vadd.f32 %v1119_v59, %v1101_v56  ;;  %v179_v23 = vld [vmem:[%s1639_s3 + $0x8] sm:$0xff] }
 0x171   :  { %1492 = vpow2.f32 %v1075_v24  ;;  %v1070_v57 = vsub.f32 0.0, %v1068_v47  ;;  %v1102_v2 = vadd.f32 %v1100_v49, %v1086_v58  ;;  %v1123_v4 = vmul.f32 %v1119_v59, %v1608_v6  ;;  %v178_v6 = vld [vmem:[%s1639_s3] sm:$0xff] }
 0x172   :  { %1494 = vpow2.f32 %v1095_v25  ;;  %v1105_v63 = vsub.f32 %v1089_v55, %v1103_v60  ;;  %v1104_v50 = vmul.f32 %v1100_v49, %v1092_v21  ;;  %v1120_v7 = vunpack.c.l.bf16 %v1116_v62 }
 0x173   :  { %1496 = vpow2.f32 %v1111_v26  ;;  %v1090_v1 = vsub.f32 %v1070_v57, %v1088_v61 }
 0x174   :  { %v1125_v10 = vsub.f32 %v1105_v63, %v1123_v4  ;;  %v1122_v14 = vadd.f32 %v1120_v7, %v1102_v2  ;;  %v1124_v16 = vmul.f32 %v1120_v7, %v1611_v22 }
 0x175   :  { %v1106_v12 = vsub.f32 %v1090_v1, %v1104_v50 }
 0x177   :  { %v1126_v51 = vsub.f32 %v1106_v12, %v1124_v16 }
 0x179   :  { %v1483_v27 = vpop.eup %1482 }
 0x17a   :  { %v1485_v8 = vpop.eup %1484 }
 0x17b   :  { %v1487_v28 = vpop.eup %1486  ;;  %v1077_v9 = vadd.f32 %v1485_v8, %v1483_v27 }
 0x17c   :  { %v1489_v29 = vpop.eup %1488 }
 0x17d   :  { %v1491_v30 = vpop.eup %1490  ;;  %v1097_v32 = vadd.f32 %v1489_v29, %v1077_v9 }
 0x17e   :  { %v1493_v33 = vpop.eup %1492 }
 0x17f   :  { %v1113_v35 = vadd.f32 %v1487_v28, %v1097_v32  ;;  %v1078_v36 = vadd.f32 %v1493_v33, %v1491_v30  ;;  %v1495_v37 = vpop.eup %1494 }
 0x180   :  { %v1497_v41 = vpop.eup %1496 }
 0x181   :  { %1498 = vlog2.f32 %v1113_v35  ;;  %v1098_v40 = vadd.f32 %v1495_v37, %v1078_v36 }
 0x183   :  { %v1114_v44 = vadd.f32 %v1497_v41, %v1098_v40 }
 0x185   :  { %1500 = vlog2.f32 %v1114_v44 }
 0x18e   :  { %v1499_v3 = vpop.eup %1498 }
 0x18f   :  { %v1128_v5 = vmul.f32 0.6931472, %v1499_v3 }
 0x191   :  { %v1131_v11 = vmul.f32 %v1128_v5, %v1121_v0 }
 0x192   :  { %v1501_v13 = vpop.eup %1500 }
 0x193   :  { %v1133_v15 = vadd.f32 %v1131_v11, %v1125_v10  ;;  %v1130_v17 = vmul.f32 0.6931472, %v1501_v13 }
 0x195   :  { %1135 = vadd.xlane.f32.xlu0 %v1133_v15  ;;  %v1132_v18 = vmul.f32 %v1130_v17, %v1122_v14 }
 0x197   :  { %v1134_v19 = vadd.f32 %v1132_v18, %v1126_v51 }
 0x199   :  { %1137 = vadd.xlane.f32.xlu0 %v1134_v19 }
 0x21e   :  { %v1136_v20 = vpop.xlane.xlu0 %1135 }
 0x21f   :  { %v1139_v21 = vmul.f32 %v1136_v20, %v178_v6 }
 0x221   :  { %1142 = vst.msk [vmem:[%s1640_s4] sm:$0xff] %vm1141_vm0, %v1139_v21 }
 0x222   :  { %v1138_v22 = vpop.xlane.xlu0 %1137 }
 0x223   :  { %v1140_v24 = vmul.f32 %v1138_v22, %v179_v23 }
 0x225   :  { %1143 = vst.msk [vmem:[%s1640_s4 + $0x8] sm:$0xff] %vm1141_vm0, %v1140_v24 }
 0x226   :  { %1148 = vsyncpa [#allocation3], 1 }
 0x227   :  { %1149 = vsyncpa [#allocation5], 1 }

</bundles_post_ra>
